<compile_context>
chip_gen: v5e
topology: v5e:2x2
jax: 0.10.0
libtpu: 0.0.40
codegen_flags: <defaults>
</compile_context>

<pallas_src>
from functools import partial

import jax
import jax.numpy as jnp
from jax.experimental import pallas as pl
from jax.experimental.pallas import tpu as pltpu

TILE_V = 128  # lane-dense vocab tile


# ----------------------------------------------------------------------------
# Kernel
# ----------------------------------------------------------------------------
def decoder_rnn_kernel(
    tok_ref,        # SMEM (1,) int32 token (also consumed by the emb index_map)
    emb_ref,        # VMEM (1, 1, Hp)  gathered embedding row (f32)
    h_ref,          # VMEM (1, Hp)     previous hidden state (f32, zero-padded)
    wih_ref,        # VMEM (Hp, 3Hp)   W_ih^T, per-gate padded, weight dtype
    whh_ref,        # VMEM (Hp, 3Hp)   W_hh^T, per-gate padded, weight dtype
    bi_ref,         # VMEM (1, 3Hp)    [b_ir+b_hr, b_iz+b_hz, b_in]  (f32)
    bhn_ref,        # VMEM (1, Hp)     b_hn (stays inside r*(...))   (f32)
    wout_ref,       # VMEM (Hp, TILE_V) W_out^T tile, weight dtype
    bout_ref,       # VMEM (1, TILE_V)  b_out tile (f32, padded vocab = -1e30)
    logits_ref,     # OUT  (1, TILE_V)  raw logits tile (f32)
    hnew_ref,       # OUT  (1, Hp)      new hidden state (f32)
    lse_ref,        # OUT  (1, 1)       global log-sum-exp (f32)
    hbf_ref,        # SCRATCH (1, Hp)   h_new in weight dtype (for MXU)
    m_ref,          # SCRATCH (1, 1)    running max (f32)
    s_ref,          # SCRATCH (1, 1)    running sum-exp (f32)
):
    del tok_ref  # gather is handled by the embedding BlockSpec index_map
    Hp = h_ref.shape[1]
    j = pl.program_id(0)

    # ---- GRU step: run once, keep h_new resident in scratch ---------------
    @pl.when(j == 0)
    def _():
        w_dtype = wih_ref.dtype
        x = jnp.maximum(emb_ref[0], 0.0)                      # (1, Hp) f32, F.relu
        h = h_ref[...]                                        # (1, Hp) f32
        # bf16 (or f32) operands go straight to the MXU, f32 accumulation.
        gi = jnp.dot(x.astype(w_dtype), wih_ref[...],
                     preferred_element_type=jnp.float32) + bi_ref[...]
        gh = jnp.dot(h.astype(w_dtype), whh_ref[...],
                     preferred_element_type=jnp.float32)
        # PyTorch gate order r, z, n; slices are lane-aligned (Hp % 128 == 0).
        r = jax.nn.sigmoid(gi[:, 0:Hp] + gh[:, 0:Hp])
        z = jax.nn.sigmoid(gi[:, Hp:2 * Hp] + gh[:, Hp:2 * Hp])
        n = jnp.tanh(gi[:, 2 * Hp:3 * Hp] + r * (gh[:, 2 * Hp:3 * Hp] + bhn_ref[...]))
        h_new = (1.0 - z) * n + z * h
        hnew_ref[...] = h_new
        hbf_ref[...] = h_new.astype(hbf_ref.dtype)
        m_ref[...] = jnp.full_like(m_ref, -1e37)
        s_ref[...] = jnp.zeros_like(s_ref)

    # ---- Output projection tile + online (max, sum-exp) -------------------
    logits = jnp.dot(hbf_ref[...], wout_ref[...],
                     preferred_element_type=jnp.float32) + bout_ref[...]
    logits_ref[...] = logits

    m_old = m_ref[...]                                        # (1, 1)
    m_new = jnp.maximum(m_old, jnp.max(logits, axis=1, keepdims=True))
    s_ref[...] = (s_ref[...] * jnp.exp(m_old - m_new)
                  + jnp.sum(jnp.exp(logits - m_new), axis=1, keepdims=True))
    m_ref[...] = m_new

    @pl.when(j == pl.num_programs(0) - 1)
    def _():
        lse_ref[...] = m_ref[...] + jnp.log(s_ref[...])


# ----------------------------------------------------------------------------
# One-time weight preparation (cache this across decode steps)
# ----------------------------------------------------------------------------
def _round_up(x, m):
    return (x + m - 1) // m * m


def prepare_decoder_params(params, weight_dtype=jnp.float32, tile_v=TILE_V):
    """Pre-transpose / pad / pre-sum once; reuse for every decode step.

    H and V are zero-padded to lane multiples; padded vocab logits are forced
    to -1e30 via the bias so they never affect the softmax.
    """
    V, H = params["embedding"].shape
    Hp = _round_up(H, 128)
    Vp = _round_up(V, tile_v)

    def pad2(x, rows, cols):
        return jnp.pad(x, ((0, rows - x.shape[0]), (0, cols - x.shape[1])))

    def pad1(v):
        return jnp.pad(v, (0, Hp - H))

    # Embedding: (V, 1, Hp) so the scalar-prefetch row gather uses a clean
    # lane-aligned (1, 1, Hp) block.
    emb = jnp.pad(params["embedding"], ((0, 0), (0, Hp - H)))
    emb = emb.reshape(V, 1, Hp).astype(jnp.float32)

    def gate_stack_t(w):  # (3H, H) -> (Hp, 3Hp): per-gate transpose + zero pad
        return jnp.concatenate(
            [pad2(w[g * H:(g + 1) * H, :].T, Hp, Hp) for g in range(3)], axis=1)

    b_ih, b_hh = params["b_ih"], params["b_hh"]
    b_i = jnp.concatenate([pad1(b_ih[:H] + b_hh[:H]),
                           pad1(b_ih[H:2 * H] + b_hh[H:2 * H]),
                           pad1(b_ih[2 * H:])])[None, :].astype(jnp.float32)
    b_hn = pad1(b_hh[2 * H:])[None, :].astype(jnp.float32)

    w_out_t = pad2(params["w_out"].T, Hp, Vp).astype(weight_dtype)
    b_out = jnp.full((Vp,), -1e30, jnp.float32).at[:V].set(
        params["b_out"].astype(jnp.float32))[None, :]

    return {
        "embedding": emb,                                         # (V, 1, Hp) f32
        "w_ih_t": gate_stack_t(params["w_ih"]).astype(weight_dtype),  # (Hp, 3Hp)
        "w_hh_t": gate_stack_t(params["w_hh"]).astype(weight_dtype),  # (Hp, 3Hp)
        "b_i": b_i,                                               # (1, 3Hp)
        "b_hn": b_hn,                                             # (1, Hp)
        "w_out_t": w_out_t,                                       # (Hp, Vp)
        "b_out": b_out,                                           # (1, Vp)
    }


# ----------------------------------------------------------------------------
# Per-step forward (jitted; takes the cached prepared params)
# ----------------------------------------------------------------------------
@partial(jax.jit, static_argnames=("tile_v",))
def decoder_rnn_forward(token_idx, hidden, prep, *, tile_v=TILE_V):
    """token_idx: scalar int; hidden: (1,1,H) f32 -> ((1,V) logp, (1,1,H) hidden)."""
    H = hidden.shape[-1]
    V = prep["embedding"].shape[0]
    Hp = prep["w_hh_t"].shape[0]
    Vp = prep["w_out_t"].shape[1]
    assert Vp % tile_v == 0
    num_v_tiles = Vp // tile_v

    # Clamp the token: Pallas does not bounds-check VMEM refs / index_maps.
    tok = jnp.clip(jnp.asarray(token_idx, jnp.int32), 0, V - 1).reshape(1)
    h_p = jnp.pad(hidden.reshape(1, H).astype(jnp.float32), ((0, 0), (0, Hp - H)))

    w_bytes = sum(int(prep[k].size) * prep[k].dtype.itemsize
                  for k in ("w_ih_t", "w_hh_t", "w_out_t"))
    act_bytes = 4 * (Hp + 3 * Hp + Hp + 2 * Vp + 2 * Hp + 1)
    cost = pl.CostEstimate(
        flops=2 * Hp * (6 * Hp + Vp),
        transcendentals=3 * Hp + Vp,
        bytes_accessed=int(w_bytes + act_bytes),
    )

    grid_spec = pltpu.PrefetchScalarGridSpec(
        num_scalar_prefetch=1,
        grid=(num_v_tiles,),
        in_specs=[
            # Single embedding row, gathered via the prefetched token index.
            pl.BlockSpec((1, 1, Hp), lambda j, tok: (tok[0], 0, 0)),
            pl.BlockSpec((1, Hp), lambda j, tok: (0, 0)),         # h
            pl.BlockSpec((Hp, 3 * Hp), lambda j, tok: (0, 0)),    # W_ih^T
            pl.BlockSpec((Hp, 3 * Hp), lambda j, tok: (0, 0)),    # W_hh^T
            pl.BlockSpec((1, 3 * Hp), lambda j, tok: (0, 0)),     # b_i
            pl.BlockSpec((1, Hp), lambda j, tok: (0, 0)),         # b_hn
            pl.BlockSpec((Hp, tile_v), lambda j, tok: (0, j)),    # W_out^T tile
            pl.BlockSpec((1, tile_v), lambda j, tok: (0, j)),     # b_out tile
        ],
        out_specs=(
            pl.BlockSpec((1, tile_v), lambda j, tok: (0, j)),     # logits tile
            pl.BlockSpec((1, Hp), lambda j, tok: (0, 0)),         # h_new
            pl.BlockSpec((1, 1), lambda j, tok: (0, 0)),          # lse
        ),
        scratch_shapes=[
            pltpu.VMEM((1, Hp), prep["w_out_t"].dtype),           # h_new (weight dtype)
            pltpu.VMEM((1, 1), jnp.float32),                      # running max
            pltpu.VMEM((1, 1), jnp.float32),                      # running sum-exp
        ],
    )

    logits, h_new_p, lse = pl.pallas_call(
        decoder_rnn_kernel,
        out_shape=(
            jax.ShapeDtypeStruct((1, Vp), jnp.float32),
            jax.ShapeDtypeStruct((1, Hp), jnp.float32),
            jax.ShapeDtypeStruct((1, 1), jnp.float32),
        ),
        grid_spec=grid_spec,
        compiler_params=pltpu.CompilerParams(
            dimension_semantics=("arbitrary",),
            vmem_limit_bytes=32 * 1024 * 1024,
        ),
        cost_estimate=cost,
    )(tok, prep["embedding"], h_p, prep["w_ih_t"], prep["w_hh_t"],
      prep["b_i"], prep["b_hn"], prep["w_out_t"], prep["b_out"])

    # Finalize log-softmax with the globally-correct lse; strip padding.
    logp = logits[:, :V] - lse
    return logp, h_new_p[:, :H].reshape(1, 1, H)


# ----------------------------------------------------------------------------
# Pure-JAX references mirroring PyTorch DecoderRNN.forward
# ----------------------------------------------------------------------------
def reference_forward(token_idx, hidden, params):
    H = params["embedding"].shape[1]
    x = jnp.maximum(params["embedding"][token_idx][None, :], 0.0)
    h = hidden.reshape(1, H)
    gi = x @ params["w_ih"].T + params["b_ih"]
    gh = h @ params["w_hh"].T + params["b_hh"]
    r = jax.nn.sigmoid(gi[:, 0:H] + gh[:, 0:H])
    z = jax.nn.sigmoid(gi[:, H:2 * H] + gh[:, H:2 * H])
    n = jnp.tanh(gi[:, 2 * H:] + r * gh[:, 2 * H:])
    h_new = (1.0 - z) * n + z * h
    logits = h_new @ params["w_out"].T + params["b_out"]
    return jax.nn.log_softmax(logits, axis=1), h_new.reshape(1, 1, H)


def reference_forward_bf16(token_idx, hidden, params):
    """Mirrors the kernel's bf16 mode: bf16 weights & activations, f32 accumulate."""
    H = params["embedding"].shape[1]
    wd = jnp.bfloat16
    x = jnp.maximum(params["embedding"][token_idx][None, :], 0.0).astype(wd)
    h = hidden.reshape(1, H)
    gi = jnp.dot(x, params["w_ih"].astype(wd).T,
                 preferred_element_type=jnp.float32) + params["b_ih"]
    gh = jnp.dot(h.astype(wd), params["w_hh"].astype(wd).T,
                 preferred_element_type=jnp.float32) + params["b_hh"]
    r = jax.nn.sigmoid(gi[:, 0:H] + gh[:, 0:H])
    z = jax.nn.sigmoid(gi[:, H:2 * H] + gh[:, H:2 * H])
    n = jnp.tanh(gi[:, 2 * H:] + r * gh[:, 2 * H:])
    h_new = (1.0 - z) * n + z * h
    logits = jnp.dot(h_new.astype(wd), params["w_out"].astype(wd).T,
                     preferred_element_type=jnp.float32) + params["b_out"]
    return jax.nn.log_softmax(logits, axis=1), h_new.reshape(1, 1, H)


def init_params(key, hidden_size, output_size):
    ks = jax.random.split(key, 7)
    bound = 1.0 / jnp.sqrt(hidden_size)
    return {
        "embedding": jax.random.normal(ks[0], (output_size, hidden_size), jnp.float32),
        "w_ih": jax.random.uniform(ks[1], (3 * hidden_size, hidden_size), jnp.float32, -bound, bound),
        "w_hh": jax.random.uniform(ks[2], (3 * hidden_size, hidden_size), jnp.float32, -bound, bound),
        "b_ih": jax.random.uniform(ks[3], (3 * hidden_size,), jnp.float32, -bound, bound),
        "b_hh": jax.random.uniform(ks[4], (3 * hidden_size,), jnp.float32, -bound, bound),
        "w_out": jax.random.uniform(ks[5], (output_size, hidden_size), jnp.float32, -bound, bound),
        "b_out": jax.random.uniform(ks[6], (output_size,), jnp.float32, -bound, bound),
    }


if __name__ == "__main__":
    hidden_size = 32
    output_size = 200   # vocab > 128 so the V grid axis has 2 tiles

    key = jax.random.PRNGKey(0)
    kp, kh = jax.random.split(key)
    params = init_params(kp, hidden_size, output_size)
    hidden = jax.random.normal(kh, (1, 1, hidden_size), jnp.float32)

    # --- f32 weights: match the exact PyTorch-style reference ----------------
    prep_f32 = prepare_decoder_params(params, weight_dtype=jnp.float32)
    h_run, h_ref_run = hidden, hidden
    for tok in (5, 137):
        logp, h_new = decoder_rnn_forward(jnp.int32(tok), hidden, prep_f32)
        jax.block_until_ready((logp, h_new))
        ref_logp, ref_h = reference_forward(tok, hidden, params)
        assert logp.shape == (1, output_size) and h_new.shape == (1, 1, hidden_size)
        assert jnp.allclose(logp, ref_logp, rtol=1e-4, atol=1e-4)
        assert jnp.allclose(h_new, ref_h, rtol=1e-4, atol=1e-4)
        h_run, h_ref_run = h_new, ref_h

    # Chain a second step on the produced hidden (exercises recurrence padding).
    logp2, h2 = decoder_rnn_forward(jnp.int32(7), h_run, prep_f32)
    jax.block_until_ready((logp2, h2))
    ref_logp2, ref_h2 = reference_forward(7, h_ref_run, params)
    assert jnp.allclose(logp2, ref_logp2, rtol=1e-3, atol=1e-3)
    assert jnp.allclose(h2, ref_h2, rtol=1e-3, atol=1e-3)

    # --- bf16 weight storage: compare vs a matching bf16 reference -----------
    prep_bf16 = prepare_decoder_params(params, weight_dtype=jnp.bfloat16)
    logp_bf, h_bf = decoder_rnn_forward(jnp.int32(5), hidden, prep_bf16)
    jax.block_until_ready((logp_bf, h_bf))
    ref_logp_bf, ref_h_bf = reference_forward_bf16(5, hidden, params)
    assert jnp.allclose(logp_bf, ref_logp_bf, rtol=5e-3, atol=5e-3)
    assert jnp.allclose(h_bf, ref_h_bf, rtol=5e-3, atol=5e-3)

    print("KERNEL_OK")
</pallas_src>

<mosaic_0001>
module attributes {stable_mosaic.version = 11 : i64} {
  func.func @decoder_rnn_kernel(%arg0: i32, %arg1: memref<1xi32, #tpu.memory_space<smem>>, %arg2: memref<1x1x128xf32, #tpu.memory_space<vmem>>, %arg3: memref<1x128xf32, #tpu.memory_space<vmem>>, %arg4: memref<128x384xf32, #tpu.memory_space<vmem>>, %arg5: memref<128x384xf32, #tpu.memory_space<vmem>>, %arg6: memref<1x384xf32, #tpu.memory_space<vmem>>, %arg7: memref<1x128xf32, #tpu.memory_space<vmem>>, %arg8: memref<128x128xf32, #tpu.memory_space<vmem>>, %arg9: memref<1x128xf32, #tpu.memory_space<vmem>>, %arg10: memref<1x128xf32, #tpu.memory_space<vmem>>, %arg11: memref<1x128xf32, #tpu.memory_space<vmem>>, %arg12: memref<1x1xf32, #tpu.memory_space<vmem>>, %arg13: memref<1x128xf32, #tpu.memory_space<vmem>>, %arg14: memref<1x1xf32, #tpu.memory_space<vmem>>, %arg15: memref<1x1xf32, #tpu.memory_space<vmem>>) attributes {dimension_semantics = [#tpu.dimension_semantics<arbitrary>], iteration_bounds = array<i64: 2>, scalar_prefetch = 1 : i64, scratch_operands = 3 : i64, tpu.core_type = #tpu.core_type<tc>, window_params = [{transform_indices = @transform_0, window_bounds = array<i64: 1, 1, 128>}, {pipeline_mode = #tpu.pipeline_mode<synchronous>, transform_indices = @transform_1, window_bounds = array<i64: 1, 128>}, {pipeline_mode = #tpu.pipeline_mode<synchronous>, transform_indices = @transform_2, window_bounds = array<i64: 128, 384>}, {pipeline_mode = #tpu.pipeline_mode<synchronous>, transform_indices = @transform_3, window_bounds = array<i64: 128, 384>}, {pipeline_mode = #tpu.pipeline_mode<synchronous>, transform_indices = @transform_4, window_bounds = array<i64: 1, 384>}, {pipeline_mode = #tpu.pipeline_mode<synchronous>, transform_indices = @transform_5, window_bounds = array<i64: 1, 128>}, {transform_indices = @transform_6, window_bounds = array<i64: 128, 128>}, {transform_indices = @transform_7, window_bounds = array<i64: 1, 128>}, {transform_indices = @transform_8, window_bounds = array<i64: 1, 128>}, {pipeline_mode = #tpu.pipeline_mode<synchronous>, transform_indices = @transform_9, window_bounds = array<i64: 1, 128>}, {pipeline_mode = #tpu.pipeline_mode<synchronous>, transform_indices = @transform_10, window_bounds = array<i64: 1, 1>}]} {
    %c0_i32 = arith.constant 0 : i32
    %0 = arith.cmpi eq, %arg0, %c0_i32 : i32
    %1 = arith.extui %0 : i1 to i32
    %c0_i32_0 = arith.constant 0 : i32
    %2 = arith.cmpi ne, %1, %c0_i32_0 : i32
    scf.if %2 {
      %c0_19 = arith.constant 0 : index
      %c0_20 = arith.constant 0 : index
      %c0_21 = arith.constant 0 : index
      %28 = vector.load %arg2[%c0_19, %c0_20, %c0_21] : memref<1x1x128xf32, #tpu.memory_space<vmem>>, vector<1x1x128xf32>
      %29 = vector.shape_cast %28 : vector<1x1x128xf32> to vector<1x128xf32>
      %cst_22 = arith.constant 0.000000e+00 : f32
      %30 = vector.broadcast %cst_22 : f32 to vector<1x128xf32>
      %31 = arith.maximumf %29, %30 : vector<1x128xf32>
      %c0_23 = arith.constant 0 : index
      %c0_24 = arith.constant 0 : index
      %32 = vector.load %arg3[%c0_23, %c0_24] : memref<1x128xf32, #tpu.memory_space<vmem>>, vector<1x128xf32>
      %c0_25 = arith.constant 0 : index
      %c0_26 = arith.constant 0 : index
      %33 = vector.load %arg4[%c0_25, %c0_26] : memref<128x384xf32, #tpu.memory_space<vmem>>, vector<128x384xf32>
      %cst_27 = arith.constant dense<0.000000e+00> : vector<1x384xf32>
      %34 = tpu.matmul %31, %33, %cst_27 {dimension_numbers = #tpu.dot_dimension_numbers<[1], [0], [0], [1], [0, 0, 1, 1], [], []>} : vector<1x128xf32>, vector<128x384xf32>, vector<1x384xf32> -> vector<1x384xf32>
      %c0_28 = arith.constant 0 : index
      %c0_29 = arith.constant 0 : index
      %35 = vector.load %arg6[%c0_28, %c0_29] : memref<1x384xf32, #tpu.memory_space<vmem>>, vector<1x384xf32>
      %36 = arith.addf %34, %35 : vector<1x384xf32>
      %c0_30 = arith.constant 0 : index
      %c0_31 = arith.constant 0 : index
      %37 = vector.load %arg5[%c0_30, %c0_31] : memref<128x384xf32, #tpu.memory_space<vmem>>, vector<128x384xf32>
      %cst_32 = arith.constant dense<0.000000e+00> : vector<1x384xf32>
      %38 = tpu.matmul %32, %37, %cst_32 {dimension_numbers = #tpu.dot_dimension_numbers<[1], [0], [0], [1], [0, 0, 1, 1], [], []>} : vector<1x128xf32>, vector<128x384xf32>, vector<1x384xf32> -> vector<1x384xf32>
      %39 = vector.extract_strided_slice %36 {offsets = [0, 0], sizes = [1, 128], strides = [1, 1]} : vector<1x384xf32> to vector<1x128xf32>
      %40 = vector.extract_strided_slice %38 {offsets = [0, 0], sizes = [1, 128], strides = [1, 1]} : vector<1x384xf32> to vector<1x128xf32>
      %41 = arith.addf %39, %40 : vector<1x128xf32>
      %42 = arith.negf %41 : vector<1x128xf32>
      %43 = math.exp %42 : vector<1x128xf32>
      %cst_33 = arith.constant 1.000000e+00 : f32
      %44 = vector.broadcast %cst_33 : f32 to vector<1x128xf32>
      %45 = arith.addf %44, %43 : vector<1x128xf32>
      %46 = arith.divf %44, %45 : vector<1x128xf32>
      %47 = vector.extract_strided_slice %36 {offsets = [0, 128], sizes = [1, 128], strides = [1, 1]} : vector<1x384xf32> to vector<1x128xf32>
      %48 = vector.extract_strided_slice %38 {offsets = [0, 128], sizes = [1, 128], strides = [1, 1]} : vector<1x384xf32> to vector<1x128xf32>
      %49 = arith.addf %47, %48 : vector<1x128xf32>
      %50 = arith.negf %49 : vector<1x128xf32>
      %51 = math.exp %50 : vector<1x128xf32>
      %cst_34 = arith.constant 1.000000e+00 : f32
      %52 = vector.broadcast %cst_34 : f32 to vector<1x128xf32>
      %53 = arith.addf %52, %51 : vector<1x128xf32>
      %54 = arith.divf %52, %53 : vector<1x128xf32>
      %55 = vector.extract_strided_slice %36 {offsets = [0, 256], sizes = [1, 128], strides = [1, 1]} : vector<1x384xf32> to vector<1x128xf32>
      %56 = vector.extract_strided_slice %38 {offsets = [0, 256], sizes = [1, 128], strides = [1, 1]} : vector<1x384xf32> to vector<1x128xf32>
      %c0_35 = arith.constant 0 : index
      %c0_36 = arith.constant 0 : index
      %57 = vector.load %arg7[%c0_35, %c0_36] : memref<1x128xf32, #tpu.memory_space<vmem>>, vector<1x128xf32>
      %58 = arith.addf %56, %57 : vector<1x128xf32>
      %59 = arith.mulf %46, %58 : vector<1x128xf32>
      %60 = arith.addf %55, %59 : vector<1x128xf32>
      %61 = math.tanh %60 : vector<1x128xf32>
      %cst_37 = arith.constant 1.000000e+00 : f32
      %62 = vector.broadcast %cst_37 : f32 to vector<1x128xf32>
      %63 = arith.subf %62, %54 : vector<1x128xf32>
      %64 = arith.mulf %63, %61 : vector<1x128xf32>
      %65 = arith.mulf %54, %32 : vector<1x128xf32>
      %66 = arith.addf %64, %65 : vector<1x128xf32>
      %c0_38 = arith.constant 0 : index
      %c0_39 = arith.constant 0 : index
      %67 = vector.load %arg11[%c0_38, %c0_39] : memref<1x128xf32, #tpu.memory_space<vmem>>, vector<1x128xf32>
      tpu.vector_store %arg11[%c0_38, %c0_39], %66 {strides = array<i32>} : memref<1x128xf32, #tpu.memory_space<vmem>>, vector<1x128xf32>,
      %c0_40 = arith.constant 0 : index
      %c0_41 = arith.constant 0 : index
      %68 = vector.load %arg13[%c0_40, %c0_41] : memref<1x128xf32, #tpu.memory_space<vmem>>, vector<1x128xf32>
      tpu.vector_store %arg13[%c0_40, %c0_41], %66 {strides = array<i32>} : memref<1x128xf32, #tpu.memory_space<vmem>>, vector<1x128xf32>,
      %cst_42 = arith.constant -9.99999993E+36 : f32
      %69 = vector.broadcast %cst_42 : f32 to vector<1x1xf32>
      %c0_43 = arith.constant 0 : index
      %c0_44 = arith.constant 0 : index
      %70 = vector.load %arg14[%c0_43, %c0_44] : memref<1x1xf32, #tpu.memory_space<vmem>>, vector<1x1xf32>
      tpu.vector_store %arg14[%c0_43, %c0_44], %69 {strides = array<i32>} : memref<1x1xf32, #tpu.memory_space<vmem>>, vector<1x1xf32>,
      %cst_45 = arith.constant 0.000000e+00 : f32
      %71 = vector.broadcast %cst_45 : f32 to vector<1x1xf32>
      %c0_46 = arith.constant 0 : index
      %c0_47 = arith.constant 0 : index
      %72 = vector.load %arg15[%c0_46, %c0_47] : memref<1x1xf32, #tpu.memory_space<vmem>>, vector<1x1xf32>
      tpu.vector_store %arg15[%c0_46, %c0_47], %71 {strides = array<i32>} : memref<1x1xf32, #tpu.memory_space<vmem>>, vector<1x1xf32>,
    } else {
    }
    %c0 = arith.constant 0 : index
    %c0_1 = arith.constant 0 : index
    %3 = vector.load %arg13[%c0, %c0_1] : memref<1x128xf32, #tpu.memory_space<vmem>>, vector<1x128xf32>
    %c0_2 = arith.constant 0 : index
    %c0_3 = arith.constant 0 : index
    %4 = vector.load %arg8[%c0_2, %c0_3] : memref<128x128xf32, #tpu.memory_space<vmem>>, vector<128x128xf32>
    %cst = arith.constant dense<0.000000e+00> : vector<1x128xf32>
    %5 = tpu.matmul %3, %4, %cst {dimension_numbers = #tpu.dot_dimension_numbers<[1], [0], [0], [1], [0, 0, 1, 1], [], []>} : vector<1x128xf32>, vector<128x128xf32>, vector<1x128xf32> -> vector<1x128xf32>
    %c0_4 = arith.constant 0 : index
    %c0_5 = arith.constant 0 : index
    %6 = vector.load %arg9[%c0_4, %c0_5] : memref<1x128xf32, #tpu.memory_space<vmem>>, vector<1x128xf32>
    %7 = arith.addf %5, %6 : vector<1x128xf32>
    %c0_6 = arith.constant 0 : index
    %c0_7 = arith.constant 0 : index
    %8 = vector.load %arg10[%c0_6, %c0_7] : memref<1x128xf32, #tpu.memory_space<vmem>>, vector<1x128xf32>
    tpu.vector_store %arg10[%c0_6, %c0_7], %7 {strides = array<i32>} : memref<1x128xf32, #tpu.memory_space<vmem>>, vector<1x128xf32>,
    %c0_8 = arith.constant 0 : index
    %c0_9 = arith.constant 0 : index
    %9 = vector.load %arg14[%c0_8, %c0_9] : memref<1x1xf32, #tpu.memory_space<vmem>>, vector<1x1xf32>
    %cst_10 = arith.constant dense<0xFF800000> : vector<1xf32>
    %10 = vector.multi_reduction <maximumf>, %7, %cst_10 [1] : vector<1x128xf32> to vector<1xf32>
    %11 = vector.shape_cast %10 : vector<1xf32> to vector<1x1xf32>
    %12 = arith.maximumf %9, %11 : vector<1x1xf32>
    %c0_11 = arith.constant 0 : index
    %c0_12 = arith.constant 0 : index
    %13 = vector.load %arg15[%c0_11, %c0_12] : memref<1x1xf32, #tpu.memory_space<vmem>>, vector<1x1xf32>
    %14 = arith.subf %9, %12 : vector<1x1xf32>
    %15 = math.exp %14 : vector<1x1xf32>
    %16 = arith.mulf %13, %15 : vector<1x1xf32>
    %17 = vector.broadcast %12 : vector<1x1xf32> to vector<1x128xf32>
    %18 = arith.subf %7, %17 : vector<1x128xf32>
    %19 = math.exp %18 : vector<1x128xf32>
    %cst_13 = arith.constant dense<0.000000e+00> : vector<1xf32>
    %20 = vector.multi_reduction <add>, %19, %cst_13 [1] : vector<1x128xf32> to vector<1xf32>
    %21 = vector.shape_cast %20 : vector<1xf32> to vector<1x1xf32>
    %22 = arith.addf %16, %21 : vector<1x1xf32>
    %c0_14 = arith.constant 0 : index
    %c0_15 = arith.constant 0 : index
    %23 = vector.load %arg15[%c0_14, %c0_15] : memref<1x1xf32, #tpu.memory_space<vmem>>, vector<1x1xf32>
    tpu.vector_store %arg15[%c0_14, %c0_15], %22 {strides = array<i32>} : memref<1x1xf32, #tpu.memory_space<vmem>>, vector<1x1xf32>,
    %c0_16 = arith.constant 0 : index
    %c0_17 = arith.constant 0 : index
    %24 = vector.load %arg14[%c0_16, %c0_17] : memref<1x1xf32, #tpu.memory_space<vmem>>, vector<1x1xf32>
    tpu.vector_store %arg14[%c0_16, %c0_17], %12 {strides = array<i32>} : memref<1x1xf32, #tpu.memory_space<vmem>>, vector<1x1xf32>,
    %c1_i32 = arith.constant 1 : i32
    %25 = arith.cmpi eq, %arg0, %c1_i32 : i32
    %26 = arith.extui %25 : i1 to i32
    %c0_i32_18 = arith.constant 0 : i32
    %27 = arith.cmpi ne, %26, %c0_i32_18 : i32
    scf.if %27 {
      %c0_19 = arith.constant 0 : index
      %c0_20 = arith.constant 0 : index
      %28 = vector.load %arg14[%c0_19, %c0_20] : memref<1x1xf32, #tpu.memory_space<vmem>>, vector<1x1xf32>
      %c0_21 = arith.constant 0 : index
      %c0_22 = arith.constant 0 : index
      %29 = vector.load %arg15[%c0_21, %c0_22] : memref<1x1xf32, #tpu.memory_space<vmem>>, vector<1x1xf32>
      %30 = math.log %29 : vector<1x1xf32>
      %31 = arith.addf %28, %30 : vector<1x1xf32>
      %c0_23 = arith.constant 0 : index
      %c0_24 = arith.constant 0 : index
      %32 = vector.load %arg12[%c0_23, %c0_24] : memref<1x1xf32, #tpu.memory_space<vmem>>, vector<1x1xf32>
      tpu.vector_store %arg12[%c0_23, %c0_24], %31 {strides = array<i32>} : memref<1x1xf32, #tpu.memory_space<vmem>>, vector<1x1xf32>,
    } else {
    }
    return
  }
  func.func @transform_0(%arg0: i32, %arg1: memref<1xi32, #tpu.memory_space<smem>>) -> (i32, i32, i32) {
    %c0 = arith.constant 0 : index
    %0 = memref.load %arg1[%c0] : memref<1xi32, #tpu.memory_space<smem>>
    %c0_i32 = arith.constant 0 : i32
    %c0_i32_0 = arith.constant 0 : i32
    %c0_i32_1 = arith.constant 0 : i32
    return %0, %c0_i32, %c0_i32_0 : i32, i32, i32
  }
  func.func @transform_1(%arg0: i32, %arg1: memref<1xi32, #tpu.memory_space<smem>>) -> (i32, i32) {
    %c0_i32 = arith.constant 0 : i32
    %c0_i32_0 = arith.constant 0 : i32
    %c0_i32_1 = arith.constant 0 : i32
    return %c0_i32, %c0_i32_0 : i32, i32
  }
  func.func @transform_2(%arg0: i32, %arg1: memref<1xi32, #tpu.memory_space<smem>>) -> (i32, i32) {
    %c0_i32 = arith.constant 0 : i32
    %c0_i32_0 = arith.constant 0 : i32
    %c0_i32_1 = arith.constant 0 : i32
    return %c0_i32, %c0_i32_0 : i32, i32
  }
  func.func @transform_3(%arg0: i32, %arg1: memref<1xi32, #tpu.memory_space<smem>>) -> (i32, i32) {
    %c0_i32 = arith.constant 0 : i32
    %c0_i32_0 = arith.constant 0 : i32
    %c0_i32_1 = arith.constant 0 : i32
    return %c0_i32, %c0_i32_0 : i32, i32
  }
  func.func @transform_4(%arg0: i32, %arg1: memref<1xi32, #tpu.memory_space<smem>>) -> (i32, i32) {
    %c0_i32 = arith.constant 0 : i32
    %c0_i32_0 = arith.constant 0 : i32
    %c0_i32_1 = arith.constant 0 : i32
    return %c0_i32, %c0_i32_0 : i32, i32
  }
  func.func @transform_5(%arg0: i32, %arg1: memref<1xi32, #tpu.memory_space<smem>>) -> (i32, i32) {
    %c0_i32 = arith.constant 0 : i32
    %c0_i32_0 = arith.constant 0 : i32
    %c0_i32_1 = arith.constant 0 : i32
    return %c0_i32, %c0_i32_0 : i32, i32
  }
  func.func @transform_6(%arg0: i32, %arg1: memref<1xi32, #tpu.memory_space<smem>>) -> (i32, i32) {
    %c0_i32 = arith.constant 0 : i32
    %c0_i32_0 = arith.constant 0 : i32
    return %c0_i32, %arg0 : i32, i32
  }
  func.func @transform_7(%arg0: i32, %arg1: memref<1xi32, #tpu.memory_space<smem>>) -> (i32, i32) {
    %c0_i32 = arith.constant 0 : i32
    %c0_i32_0 = arith.constant 0 : i32
    return %c0_i32, %arg0 : i32, i32
  }
  func.func @transform_8(%arg0: i32, %arg1: memref<1xi32, #tpu.memory_space<smem>>) -> (i32, i32) {
    %c0_i32 = arith.constant 0 : i32
    %c0_i32_0 = arith.constant 0 : i32
    return %c0_i32, %arg0 : i32, i32
  }
  func.func @transform_9(%arg0: i32, %arg1: memref<1xi32, #tpu.memory_space<smem>>) -> (i32, i32) {
    %c0_i32 = arith.constant 0 : i32
    %c0_i32_0 = arith.constant 0 : i32
    %c0_i32_1 = arith.constant 0 : i32
    return %c0_i32, %c0_i32_0 : i32, i32
  }
  func.func @transform_10(%arg0: i32, %arg1: memref<1xi32, #tpu.memory_space<smem>>) -> (i32, i32) {
    %c0_i32 = arith.constant 0 : i32
    %c0_i32_0 = arith.constant 0 : i32
    %c0_i32_1 = arith.constant 0 : i32
    return %c0_i32, %c0_i32_0 : i32, i32
  }
}

</mosaic_0001>

<bundles_post_ra>
// kernel: decoder_rnn_forward.1
= control target key start
LH: loop header
LB: loop body
LE: loop exit
PB: predicated region body
PF: predicated region fallthrough
CT: control target
= control target key end

     0   :  { %s1612_s0 = inlined_call_operand.<no memory space> [shape: s32[1], index: 0, kind: input, shape index: {}]   ;;  %s1613_s1 = inlined_call_operand.hbm [shape: f32[200,1,128], index: 1, kind: input, shape index: {}]   ;;  %s1614_s2 = inlined_call_operand.vmem [shape: f32[1,128], index: 2, kind: input, shape index: {}]   ;;  %s1615_s3 = inlined_call_operand.hbm [shape: f32[128,384], index: 3, kind: input, shape index: {}]   ;;  %s1616_s4 = inlined_call_operand.hbm [shape: f32[128,384], index: 4, kind: input, shape index: {}]   ;;  %s1617_s5 = inlined_call_operand.vmem [shape: f32[1,384], index: 5, kind: input, shape index: {}]   ;;  %s1618_s6 = inlined_call_operand.vmem [shape: f32[1,128], index: 6, kind: input, shape index: {}]   ;;  %s1619_s7 = inlined_call_operand.hbm [shape: f32[128,256], index: 7, kind: input, shape index: {}]   ;;  %s1620_s8 = inlined_call_operand.vmem [shape: f32[1,256], index: 8, kind: input, shape index: {}]   ;;  %s1621_s9 = inlined_call_operand.vmem [shape: f32[1,256], index: 9, kind: output, shape index: {0}]   ;;  %s1622_s10 = inlined_call_operand.vmem [shape: f32[1,128], index: 10, kind: output, shape index: {1}]   ;;  %s1623_s11 = inlined_call_operand.hbm [shape: f32[1,1], index: 11, kind: output, shape index: {2}]  }
   0x1   :  { %1627 = sst [smem:[#allocation21_spill]] %s1615_s3 }
   0x2   :  { %1628 = sst [smem:[#allocation22_spill]] %s1616_s4 }
   0x3   :  { %1629 = sst [smem:[#allocation23_spill]] %s1623_s11 }
   0x4   :  { %17 = sst [smem:[#allocation6]] %s1612_s0 }
   0x5   :  { %18 = vsyncpa [#allocation8], 0 }
   0x6   :  { %19 = vsyncpa [#allocation11], 0 }
   0x7   :  { %20 = vsyncpa [#allocation14], 0 }
   0x8   :  { %22 = vsyncpa [#allocation14 + $0x1], 0 }
   0x9   :  { %23 = vsyncpa [#allocation9], 0  ;;  %s1372_s19 = smov 0   ;;  %s1374_s20 = smov 0  }
   0xa   :  { %s1376_s21 = smov 0   ;;  %s1378_s22 = smov 0  }
   0xb   :  { %s1380_s23 = smov 0   ;;  %s1382_s24 = smov 0  }
   0xc LB: > { %1630 = sst [smem:[#allocation20_spill]] %s1291_s23  ;;  %s1399_s0 = sadd.s32 4294967295, %s1295_s24   ;;  %s1295_s24 = sphi %s1382_s24, %s1647_s24   ;;  %s1291_s23 = sphi %s1380_s23, %s1607_s23   ;;  %s1287_s22 = sphi %s1378_s22, %s1643_s22   ;;  %s1283_s21 = sphi %s1376_s21, %s1646_s21   ;;  %s1279_s20 = sphi %s1374_s20, %s1645_s20   ;;  %s1275_s19 = sphi %s1372_s19, %s1644_s19  }
   0xd   : > { %p182_p0 = scmp.ne.s32.totalorder %s1279_s20, %s1275_s19  ;;  %p52_p1 = scmp.eq.s32.totalorder %s1399_s0, 0 }
   0xe   : > { %p941_p2 = scmp.ge.s32.totalorder %s1295_s24, 1  ;;  %p287_p3 = scmp.lt.s32.totalorder %s1295_s24, 3 }
   0xf   : > { %p1408_p5 = por %p182_p0, %p52_p1  ;;  %s1632_s3 = sld [smem:[#allocation21_spill]] }
  0x10   : > { %p1415_p6 = pnand %p941_p2, %p287_p3  ;;  %s1297_s30 = smov [#allocation10]  }
  0x11   : > { %s317_s12 = sshll.u32 %s1297_s30, 4  ;;  %s1624_s14 = smov 384   ;;  %s318_s12 = int_to_ptr.vmem [resolvable:$true] %s317_s12 }
  0x12   : > { %p975_p7 = pneg %p1415_p6  ;;  %s1625_s15 = smov 24  }
  0x13   : > { %s33_s16 = sld [smem:[#allocation6]]  ;;  %p51_p9 = scmp.ne.s32.totalorder %s1291_s23, %s1287_s22 }
  0x14   : > { %p1426_p8 = pnand %p975_p7, %p52_p1  ;;  %s1635_s4 = sld [smem:[#allocation22_spill]] }
  0x15   : > { %s315_s28 = sshll.u32 %s1632_s3, 4  ;;  %p1441_p10 = por %p52_p1, %p51_p9  ;;  %s316_s28 = int_to_ptr.hbm [resolvable:$true] %s315_s28 }
  0x16   : > { %981 = dma.hbm_to_vmem [thread:$0]  (!%p1426_p8), %s316_s28, 6144, %s318_s12, [#allocation11], %s1624_s14, %s1624_s14, %s1625_s15  }
  0x17   : > { %s1300_s27 = smov [#allocation7]   ;;  %p1450_p11 = pnand %p975_p7, %p1441_p10 }
  0x18   : > { %s303_s30 = sshll.u32 %s1300_s27, 4  ;;  %s304_s30 = int_to_ptr.vmem [resolvable:$true] %s303_s30 }
  0x19   : > { %s299_s17 = scalar_lea.hbm %s1613_s1, %s33_s16  ;;  %p1115_p13 = pneg %p1450_p11 }
  0x1a   : > { %s329_s19 = sshll.u32 %s1635_s4, 4  ;;  %s301_s18 = sshll.u32 %s299_s17, 4  ;;  %s330_s19 = int_to_ptr.hbm [resolvable:$true] %s329_s19  ;;  %s302_s18 = int_to_ptr.hbm [resolvable:$true] %s301_s18 }
  0x1b   : > { %s1111_s14 = sshra.s32 %s302_s18, 4  ;;  %s1118_s4 = scalar_lea.hbm %s1613_s1, 200  ;;  %s1112_s14 = int_to_ptr.hbm [resolvable:$true] %s1111_s14 }
  0x1c   : > { %s1113_s15 = scalar_lea.hbm %s1112_s14, 1  ;;  %p1119_p3 = scmp.lt.s32.totalorder %s1112_s14, %s1613_s1 }
  0x1d   : > { %p1114_p12 = scmp.ne.s32.totalorder %s1112_s14, %s1113_s15  ;;  %p1120_p7 = scmp.lt.s32.totalorder %s1118_s4, %s1113_s15 }
  0x1f   : > { %p1116_p0 = pnand %p1115_p13, %p1114_p12  ;;  %p1121_p9 = por %p1120_p7, %p1119_p3 }
  0x21   : > { %p1117_p2 = pneg %p1116_p0 }
  0x23   : > { %p1122_p4 = pnand %p1121_p9, %p1117_p2 }
  0x25   : > { %1125 = shalt.err (!%p1122_p4)
}
  0x26   : > { %978 = dma.hbm_to_vmem [thread:$0]  (!%p1450_p11), %s302_s18, 16, %s304_s30, [#allocation8]  }
  0x27   : > { %s1301_s3 = smov [#allocation12]   ;;  %s1638_s4 = smov 24  }
  0x28   : > { %s331_s11 = sshll.u32 %s1301_s3, 4  ;;  %s1639_s23 = smov 384   ;;  %s332_s11 = int_to_ptr.vmem [resolvable:$true] %s331_s11 }
  0x29   : > { %984 = dma.hbm_to_vmem [thread:$0]  (!%p1426_p8), %s330_s19, 6144, %s332_s11, [#allocation11], %s1639_s23, %s1639_s23, %s1638_s4  }
  0x2a   : > { %s1473_s14 = sadd.s32 1, %s1295_s24   ;;  %s169_s15 = sadd.s32 1, %s1283_s21 }
  0x2b   : > { %s166_s16 = ssub.s32 %s1295_s24, %s1473_s14  ;;  %p176_p4 = scmp.ne.s32.totalorder %s1283_s21, %s1279_s20 }
  0x2c   : > { %p167_p12 = scmp.eq.s32.totalorder %s166_s16, 0  ;;  %p177_p13 = scmp.eq.s32.totalorder %s1295_s24, 0 }
  0x2d   : > { %p991_p0 = scmp.lt.s32.totalorder %s1295_s24, 2  ;;  %s351_s28 = sand.u32 1, %s1283_s21  }
  0x2e   : > { %s1484_s30 = scalar_select %p167_p12, %s1283_s21, %s169_s15  }
  0x2f   : > { %p178_p11 = por %p177_p13, %p176_p4  ;;  %s945_s22 = sshll.u32 %s351_s28, 7 }
  0x30   : > { %s946_s12 = sshll.u32 %s1295_s24, 3  ;;  %s355_s27 = scalar_lea.vmem [#allocation13], %s945_s22 }
  0x31   : > { %s359_s18 = scalar_lea.hbm %s1619_s7, %s946_s12  ;;  %s362_s3 = sshll.u32 %s355_s27, 4  ;;  %s363_s3 = int_to_ptr.vmem [resolvable:$true] %s362_s3 }
  0x32   : > { %s360_s19 = sshll.u32 %s359_s18, 4  ;;  %p1490_p8 = pnand %p991_p0, %p178_p11  ;;  %s361_s19 = int_to_ptr.hbm [resolvable:$true] %s360_s19 }
  0x33   : > { %s352_s4 = scalar_lea.sflag [#allocation14], %s351_s28  ;;  %s1171_s23 = sshra.s32 %s361_s19, 4  ;;  %s1172_s23 = int_to_ptr.hbm [resolvable:$true] %s1171_s23 }
  0x34   : > { %s1173_s15 = scalar_lea.hbm %s1172_s23, 128  ;;  %p1175_p3 = pneg %p1490_p8 }
  0x35   : > { %p1174_p2 = scmp.ne.s32.totalorder %s1172_s23, %s1173_s15  ;;  %s1178_s22 = scalar_lea.hbm %s1619_s7, 256 }
  0x36   : > { %p1179_p4 = scmp.lt.s32.totalorder %s1172_s23, %s1619_s7  ;;  %p1180_p12 = scmp.lt.s32.totalorder %s1178_s22, %s1173_s15 }
  0x37   : > { %p1176_p7 = pnand %p1175_p3, %p1174_p2 }
  0x38   : > { %p1181_p13 = por %p1180_p12, %p1179_p4 }
  0x39   : > { %p1177_p9 = pneg %p1176_p7 }
  0x3b   : > { %p1182_p0 = pnand %p1181_p13, %p1177_p9 }
  0x3d   : > { %1185 = shalt.err (!%p1182_p0)
}
  0x3e   : > { %s1302_s28 = smov 256   ;;  %s1303_s17 = smov 128  }
  0x3f   : > { %s1304_s18 = smov 8   ;;  %380 = sbr.rel (%p1415_p6) target bundleno = 868 (0x364), region = 52 }
  0x40   : > { %988 = dma.hbm_to_vmem [thread:$0]  (!%p1490_p8), %s361_s19, 2048, %s363_s3, %s352_s4, %s1302_s28, %s1303_s17, %s1304_s18  }
  0x44   : > { %1258 = dma.done.wait (%p1441_p10), [#allocation8], 16  }
  0x45   : > { %1260 = vsyncadd (%p1441_p10), [#allocation8], 4294967280 }
  0x46   : > { %1262 = dma.done.wait (%p52_p1), [#allocation11], 12288  }
  0x47   : > { %1264 = vsyncadd (%p52_p1), [#allocation11], 4294955008  ;;  %s397_s27 = sand.u32 1, %s1279_s20  }
  0x48   : > { %s950_s11 = sshll.u32 %s397_s27, 7  ;;  %s398_s19 = scalar_lea.sflag [#allocation14], %s397_s27 }
  0x49   : > { %s1515_s3 = scalar_lea.vmem [#allocation13], %s950_s11 }
  0x4a   : > { %1266 = dma.done.wait (%p1408_p5), %s398_s19, 2048  }
  0x4b   : > { %1268 = vsyncadd (%p1408_p5), %s398_s19, 4294965248  ;;  %p441_p6 = scmp.lt.s32.totalorder %s1399_s0, 1  ;;  %p1641_p1 = scmp.ne.s32.totalorder %s1399_s0, 0 }
  0x4d   : > { %s1523_s29 = scalar_select %p441_p6, %s1399_s0, 1 }
  0x4e   : > { %450 = sbr.rel (%p1641_p1) target bundleno = 311 (0x137), region = 72 }
  0x4f   : > { %s443_s23 = scalar_lea.vmem %s1620_s8, %s1523_s29  ;;  %s446_s16 = scalar_lea.vmem %s1621_s9, %s1523_s29 }
  0x53   : > { %v499_v0 = vld [vmem:[#allocation10 + $0x168] sm:$0xff]  ;;  %v496_v1 = vld [vmem:[#allocation10 + $0x150] sm:$0xff]  ;;  %v493_v4 = vld [vmem:[#allocation10 + $0x138] sm:$0xff]  ;;  %vm729_vm0 = vcmask 0  }
  0x54   : > { %v615_v2 = vld [vmem:[#allocation12 + $0x168] sm:$0xff]  ;;  %510 = vmatpush.msra.mxu0 %v499_v0  ;;  %v612_v3 = vld [vmem:[#allocation12 + $0x150] sm:$0xff]  ;;  %v609_v6 = vld [vmem:[#allocation12 + $0x138] sm:$0xff] }
  0x55   : > { %618 = vmatpush.msra.mxu3 %v615_v2  ;;  %v500_v5 = vld [vmem:[#allocation10 + $0x170] sm:$0xff]  ;;  %v497_v7 = vld [vmem:[#allocation10 + $0x158] sm:$0xff]  ;;  %v490_v8 = vld [vmem:[#allocation10 + $0x120] sm:$0xff] }
  0x56   : > { %511 = vmatpush.msra.mxu0 %v496_v1  ;;  %530 = vmatpush.msra.mxu1 %v500_v5  ;;  %v606_v9 = vld [vmem:[#allocation12 + $0x120] sm:$0xff]  ;;  %v487_v11 = vld [vmem:[#allocation10 + $0x108] sm:$0xff]  ;;  %v484_v14 = vld [vmem:[#allocation10 + $0xf0] sm:$0xff] }
  0x57   : > { %619 = vmatpush.msra.mxu3 %v612_v3  ;;  %v494_v10 = vld [vmem:[#allocation10 + $0x140] sm:$0xff]  ;;  %v603_v12 = vld [vmem:[#allocation12 + $0x108] sm:$0xff]  ;;  %v600_v15 = vld [vmem:[#allocation12 + $0xf0] sm:$0xff] }
  0x58   : > { %512 = vmatpush.msra.mxu0 %v493_v4  ;;  %531 = vmatpush.msra.mxu1 %v497_v7  ;;  %v491_v13 = vld [vmem:[#allocation10 + $0x128] sm:$0xff]  ;;  %v488_v16 = vld [vmem:[#allocation10 + $0x110] sm:$0xff]  ;;  %v481_v17 = vld [vmem:[#allocation10 + $0xd8] sm:$0xff] }
  0x59   : > { %620 = vmatpush.msra.mxu3 %v609_v6  ;;  %v597_v18 = vld [vmem:[#allocation12 + $0xd8] sm:$0xff]  ;;  %v478_v20 = vld [vmem:[#allocation10 + $0xc0] sm:$0xff]  ;;  %v475_v23 = vld [vmem:[#allocation10 + $0xa8] sm:$0xff] }
  0x5a   : > { %513 = vmatpush.msra.mxu0 %v490_v8  ;;  %532 = vmatpush.msra.mxu1 %v494_v10  ;;  %v485_v19 = vld [vmem:[#allocation10 + $0xf8] sm:$0xff]  ;;  %v594_v21 = vld [vmem:[#allocation12 + $0xc0] sm:$0xff]  ;;  %v591_v24 = vld [vmem:[#allocation12 + $0xa8] sm:$0xff] }
  0x5b   : > { %621 = vmatpush.msra.mxu3 %v606_v9  ;;  %v482_v22 = vld [vmem:[#allocation10 + $0xe0] sm:$0xff]  ;;  %v479_v25 = vld [vmem:[#allocation10 + $0xc8] sm:$0xff]  ;;  %v501_v26 = vld [vmem:[#allocation10 + $0x178] sm:$0xff] }
  0x5c   : > { %514 = vmatpush.msra.mxu0 %v487_v11  ;;  %533 = vmatpush.msra.mxu1 %v491_v13  ;;  %v472_v27 = vld [vmem:[#allocation10 + $0x90] sm:$0xff]  ;;  %v498_v30 = vld [vmem:[#allocation10 + $0x160] sm:$0xff]  ;;  %v469_v31 = vld [vmem:[#allocation10 + $0x78] sm:$0xff] }
  0x5d   : > { %622 = vmatpush.msra.mxu3 %v603_v12  ;;  %v588_v28 = vld [vmem:[#allocation12 + $0x90] sm:$0xff]  ;;  %550 = vmatpush.msra.mxu2 %v501_v26  ;;  %v585_v32 = vld [vmem:[#allocation12 + $0x78] sm:$0xff]  ;;  %v495_v33 = vld [vmem:[#allocation10 + $0x148] sm:$0xff] }
  0x5e   : > { %515 = vmatpush.msra.mxu0 %v484_v14  ;;  %534 = vmatpush.msra.mxu1 %v488_v16  ;;  %v476_v29 = vld [vmem:[#allocation10 + $0xb0] sm:$0xff]  ;;  %v473_v34 = vld [vmem:[#allocation10 + $0x98] sm:$0xff]  ;;  %v466_v36 = vld [vmem:[#allocation10 + $0x60] sm:$0xff] }
  0x5f   : > { %623 = vmatpush.msra.mxu3 %v600_v15  ;;  %551 = vmatpush.msra.mxu2 %v498_v30  ;;  %v492_v35 = vld [vmem:[#allocation10 + $0x130] sm:$0xff]  ;;  %v582_v37 = vld [vmem:[#allocation12 + $0x60] sm:$0xff]  ;;  %v489_v39 = vld [vmem:[#allocation10 + $0x118] sm:$0xff] }
  0x60   : > { %516 = vmatpush.msra.mxu0 %v481_v17  ;;  %535 = vmatpush.msra.mxu1 %v485_v19  ;;  %v470_v38 = vld [vmem:[#allocation10 + $0x80] sm:$0xff]  ;;  %v463_v40 = vld [vmem:[#allocation10 + $0x48] sm:$0xff]  ;;  %v460_v44 = vld [vmem:[#allocation10 + $0x30] sm:$0xff] }
  0x61   : > { %624 = vmatpush.msra.mxu3 %v597_v18  ;;  %552 = vmatpush.msra.mxu2 %v495_v33  ;;  %v579_v41 = vld [vmem:[#allocation12 + $0x48] sm:$0xff]  ;;  %v486_v43 = vld [vmem:[#allocation10 + $0x100] sm:$0xff]  ;;  %v576_v45 = vld [vmem:[#allocation12 + $0x30] sm:$0xff] }
  0x62   : > { %517 = vmatpush.msra.mxu0 %v478_v20  ;;  %536 = vmatpush.msra.mxu1 %v482_v22  ;;  %v467_v42 = vld [vmem:[#allocation10 + $0x68] sm:$0xff]  ;;  %v464_v46 = vld [vmem:[#allocation10 + $0x50] sm:$0xff]  ;;  %v457_v48 = vld [vmem:[#allocation10 + $0x18] sm:$0xff] }
  0x63   : > { %625 = vmatpush.msra.mxu3 %v594_v21  ;;  %553 = vmatpush.msra.mxu2 %v492_v35  ;;  %v483_v47 = vld [vmem:[#allocation10 + $0xe8] sm:$0xff]  ;;  %v573_v49 = vld [vmem:[#allocation12 + $0x18] sm:$0xff]  ;;  %v480_v52 = vld [vmem:[#allocation10 + $0xd0] sm:$0xff] }
  0x64   : > { %518 = vmatpush.msra.mxu0 %v475_v23  ;;  %537 = vmatpush.msra.mxu1 %v479_v25  ;;  %v451_v50 = vld [vmem:[#allocation7] sm:$0x1]  ;;  %v454_v53 = vld [vmem:[#allocation10] sm:$0xff]  ;;  %v616_v55 = vld [vmem:[#allocation12 + $0x170] sm:$0xff] }
  0x65   : > { %626 = vmatpush.msra.mxu3 %v591_v24  ;;  %554 = vmatpush.msra.mxu2 %v489_v39  ;;  %v461_v51 = vld [vmem:[#allocation10 + $0x38] sm:$0xff]  ;;  %v570_v54 = vld [vmem:[#allocation12] sm:$0xff]  ;;  %v1535_v57 = vmax.f32 %v451_v50, 0.0  ;;  %v455_v60 = vld [vmem:[#allocation10 + $0x8] sm:$0xff] }
  0x66   : > { %519 = vmatpush.msra.mxu0 %v472_v27  ;;  %538 = vmatpush.msra.mxu1 %v476_v29  ;;  %v458_v56 = vld [vmem:[#allocation10 + $0x20] sm:$0xff]  ;;  %v1540_v58 = vld [vmem:[%s1614_s2] sm:$0x1]  ;;  %v607_v2 = vld [vmem:[#allocation12 + $0x128] sm:$0xff] }
  0x67   : > { %627 = vmatpush.msra.mxu3 %v588_v28  ;;  %555 = vmatpush.msra.mxu2 %v486_v43  ;;  %v613_v59 = vld [vmem:[#allocation12 + $0x158] sm:$0xff]  ;;  %v610_v63 = vld [vmem:[#allocation12 + $0x140] sm:$0xff]  ;;  %v611_v3 = vld [vmem:[#allocation12 + $0x148] sm:$0xff] }
  0x68   : > { %520 = vmatpush.msra.mxu0 %v469_v31  ;;  %539 = vmatpush.msra.mxu1 %v473_v34  ;;  %v617_v61 = vld [vmem:[#allocation12 + $0x178] sm:$0xff]  ;;  %v614_v0 = vld [vmem:[#allocation12 + $0x160] sm:$0xff]  ;;  %v471_v4 = vld [vmem:[#allocation10 + $0x88] sm:$0xff] }
  0x69   : > { %628 = vmatpush.msra.mxu3 %v585_v32  ;;  %556 = vmatpush.msra.mxu2 %v483_v47  ;;  %v477_v62 = vld [vmem:[#allocation10 + $0xb8] sm:$0xff]  ;;  %v474_v1 = vld [vmem:[#allocation10 + $0xa0] sm:$0xff]  ;;  %v604_v5 = vld [vmem:[#allocation12 + $0x110] sm:$0xff] }
  0x6a   : > { %521 = vmatpush.msra.mxu0 %v466_v36  ;;  %540 = vmatpush.msra.mxu1 %v470_v38  ;;  %v608_v6 = vld [vmem:[#allocation12 + $0x130] sm:$0xff]  ;;  %v601_v8 = vld [vmem:[#allocation12 + $0xf8] sm:$0xff]  ;;  %v598_v11 = vld [vmem:[#allocation12 + $0xe0] sm:$0xff] }
  0x6b   : > { %629 = vmatpush.msra.mxu3 %v582_v37  ;;  %557 = vmatpush.msra.mxu2 %v480_v52  ;;  %v468_v7 = vld [vmem:[#allocation10 + $0x70] sm:$0xff]  ;;  %v605_v9 = vld [vmem:[#allocation12 + $0x118] sm:$0xff]  ;;  %v602_v12 = vld [vmem:[#allocation12 + $0x100] sm:$0xff] }
  0x6c   : > { %522 = vmatpush.msra.mxu0 %v463_v40  ;;  %541 = vmatpush.msra.mxu1 %v467_v42  ;;  %v465_v10 = vld [vmem:[#allocation10 + $0x58] sm:$0xff]  ;;  %v462_v13 = vld [vmem:[#allocation10 + $0x40] sm:$0xff]  ;;  %v595_v14 = vld [vmem:[#allocation12 + $0xc8] sm:$0xff] }
  0x6d   : > { %630 = vmatpush.msra.mxu3 %v579_v41  ;;  %558 = vmatpush.msra.mxu2 %v477_v62  ;;  %v599_v15 = vld [vmem:[#allocation12 + $0xe8] sm:$0xff]  ;;  %v592_v17 = vld [vmem:[#allocation12 + $0xb0] sm:$0xff]  ;;  %v589_v20 = vld [vmem:[#allocation12 + $0x98] sm:$0xff] }
  0x6e   : > { %523 = vmatpush.msra.mxu0 %v460_v44  ;;  %542 = vmatpush.msra.mxu1 %v464_v46  ;;  %v459_v16 = vld [vmem:[#allocation10 + $0x28] sm:$0xff]  ;;  %v596_v18 = vld [vmem:[#allocation12 + $0xd0] sm:$0xff]  ;;  %v593_v21 = vld [vmem:[#allocation12 + $0xb8] sm:$0xff] }
  0x6f   : > { %631 = vmatpush.msra.mxu3 %v576_v45  ;;  %559 = vmatpush.msra.mxu2 %v474_v1  ;;  %v456_v19 = vld [vmem:[#allocation10 + $0x10] sm:$0xff]  ;;  %v586_v22 = vld [vmem:[#allocation12 + $0x80] sm:$0xff]  ;;  %v583_v24 = vld [vmem:[#allocation12 + $0x68] sm:$0xff] }
  0x70   : > { %524 = vmatpush.msra.mxu0 %v457_v48  ;;  %543 = vmatpush.msra.mxu1 %v461_v51  ;;  %v590_v23 = vld [vmem:[#allocation12 + $0xa0] sm:$0xff]  ;;  %v587_v25 = vld [vmem:[#allocation12 + $0x88] sm:$0xff]  ;;  %v580_v26 = vld [vmem:[#allocation12 + $0x50] sm:$0xff] }
  0x71   : > { %632 = vmatpush.msra.mxu3 %v573_v49  ;;  %560 = vmatpush.msra.mxu2 %v471_v4  ;;  %v584_v27 = vld [vmem:[#allocation12 + $0x70] sm:$0xff]  ;;  %v577_v28 = vld [vmem:[#allocation12 + $0x38] sm:$0xff]  ;;  %v574_v30 = vld [vmem:[#allocation12 + $0x20] sm:$0xff] }
  0x72   : > { %525 = vmatpush.msra.mxu0 %v454_v53  ;;  %544 = vmatpush.msra.mxu1 %v458_v56  ;;  %v581_v29 = vld [vmem:[#allocation12 + $0x58] sm:$0xff]  ;;  %v578_v31 = vld [vmem:[#allocation12 + $0x40] sm:$0xff]  ;;  %v571_v32 = vld [vmem:[#allocation12 + $0x8] sm:$0xff]  ;;  %v1306_v56 = vmov 0.0  }
  0x73   : > { %633 = vmatpush.msra.mxu3 %v570_v54  ;;  %526 = vmatmul.f32.vlgmr.msra.gmra.mxu0 %v1535_v57  ;;  %v575_v33 = vld [vmem:[#allocation12 + $0x28] sm:$0xff]  ;;  %v572_v34 = vld [vmem:[#allocation12 + $0x10] sm:$0xff]  ;;  %v502_v35 = vld [vmem:[%s1617_s5] sm:$0x7]  ;;  %v1305_v54 = vmov -1e+37  }
  0x74   : > { %638 = vmatpush.msrb.mxu0 %v616_v55  ;;  %634 = vmatmul.f32.vlgmr.msra.gmra.mxu3 %v1540_v58  ;;  %v504_v36 = vperm.slane %v502_v35, 0  ;;  %v505_v44 = vperm.slane %v502_v35, 1  ;;  %730 = vst.msk [vmem:[#allocation3] sm:$0x1] %vm729_vm0, %v1305_v54 }
  0x75   : > { %545 = vmatpush.msra.mxu1 %v455_v60  ;;  %561 = vmatpush.msra.mxu2 %v468_v7  ;;  %731 = vst.msk [vmem:[#allocation4] sm:$0x1] %vm729_vm0, %v1306_v56 }
  0x76   : > { %639 = vmatpush.msrb.mxu0 %v613_v59  ;;  %546 = vmatmul.f32.vlgmr.msra.gmra.mxu1 %v1535_v57 }
  0x77   : > { %658 = vmatpush.msrb.mxu1 %v617_v61  ;;  %562 = vmatpush.msra.mxu2 %v465_v10 }
  0x78   : > { %640 = vmatpush.msrb.mxu0 %v610_v63  ;;  %v718_v63 = vld [vmem:[%s1618_s6] sm:$0x1] }
  0x79   : > { %659 = vmatpush.msrb.mxu1 %v614_v0  ;;  %563 = vmatpush.msra.mxu2 %v462_v13 }
  0x7a   : > { %641 = vmatpush.msrb.mxu0 %v607_v2 }
  0x7b   : > { %660 = vmatpush.msrb.mxu1 %v611_v3  ;;  %564 = vmatpush.msra.mxu2 %v459_v16  ;;  %v506_v3 = vperm.slane %v502_v35, 2 }
  0x7c   : > { %642 = vmatpush.msrb.mxu0 %v604_v5 }
  0x7d   : > { %661 = vmatpush.msrb.mxu1 %v608_v6  ;;  %565 = vmatpush.msra.mxu2 %v456_v19 }
  0x7e   : > { %643 = vmatpush.msrb.mxu0 %v601_v8  ;;  %566 = vmatmul.f32.vlgmr.msra.gmra.mxu2 %v1535_v57 }
  0x7f   : > { %662 = vmatpush.msrb.mxu1 %v605_v9 }
  0x80   : > { %644 = vmatpush.msrb.mxu0 %v598_v11 }
  0x81   : > { %663 = vmatpush.msrb.mxu1 %v602_v12 }
  0x82   : > { %645 = vmatpush.msrb.mxu0 %v595_v14 }
  0x83   : > { %664 = vmatpush.msrb.mxu1 %v599_v15 }
  0x84   : > { %646 = vmatpush.msrb.mxu0 %v592_v17 }
  0x85   : > { %665 = vmatpush.msrb.mxu1 %v596_v18 }
  0x86   : > { %647 = vmatpush.msrb.mxu0 %v589_v20 }
  0x87   : > { %666 = vmatpush.msrb.mxu1 %v593_v21 }
  0x88   : > { %648 = vmatpush.msrb.mxu0 %v586_v22 }
  0x89   : > { %667 = vmatpush.msrb.mxu1 %v590_v23 }
  0x8a   : > { %649 = vmatpush.msrb.mxu0 %v583_v24 }
  0x8b   : > { %668 = vmatpush.msrb.mxu1 %v587_v25 }
  0x8c   : > { %650 = vmatpush.msrb.mxu0 %v580_v26 }
  0x8d   : > { %669 = vmatpush.msrb.mxu1 %v584_v27 }
  0x8e   : > { %651 = vmatpush.msrb.mxu0 %v577_v28 }
  0x8f   : > { %670 = vmatpush.msrb.mxu1 %v581_v29 }
  0x90   : > { %652 = vmatpush.msrb.mxu0 %v574_v30 }
  0x91   : > { %671 = vmatpush.msrb.mxu1 %v578_v31 }
  0x92   : > { %653 = vmatpush.msrb.mxu0 %v571_v32 }
  0x93   : > { %654 = vmatmul.f32.vlgmr.msrb.gmra.mxu0 %v1540_v58  ;;  %672 = vmatpush.msrb.mxu1 %v575_v33 }
  0x95   : > { %673 = vmatpush.msrb.mxu1 %v572_v34 }
  0x96   : > { %674 = vmatmul.f32.vlgmr.msrb.gmra.mxu1 %v1540_v58 }
  0xf0   : > { %v527_v37 = vpop.f32.mrf.mxu0 }
  0xf1   : > { %v528_v38 = vadd.f32 %v527_v37, %v504_v36 }
  0xf3   : > { %v547_v45 = vpop.f32.mrf.mxu1 }
  0xf4   : > { %v548_v47 = vadd.f32 %v547_v45, %v505_v44 }
  0xf7   : > { %v635_v39 = vpop.f32.mrf.mxu3 }
  0xf8   : > { %v678_v40 = vadd.f32 %v635_v39, %v528_v38 }
  0xfa   : > { %v952_v41 = vmul.f32 -1.442695, %v678_v40 }
  0xfc   : > { %1064 = vpow2.f32 %v952_v41 }
 0x101   : > { %v567_v5 = vpop.f32.mrf.mxu2 }
 0x102   : > { %v1065_v42 = vpop.eup %1064  ;;  %v568_v7 = vadd.f32 %v567_v5, %v506_v3 }
 0x103   : > { %v682_v43 = vadd.f32 1.0, %v1065_v42 }
 0x105   : > { %1066 = vrcp.f32 %v682_v43  ;;  %vm688_vm1 = vweird.f32 %v682_v43  ;;  %v694_v55 = vand.u32 2147483648, %v682_v43  ;;  %v692_v59 = vand.u32 2147483647, %v682_v43 }
 0x107   : > { %v695_v62 = vor.u32 1.1754944e-38, %v694_v55  ;;  %vm693_vm4 = vcmp.eq.f32.partialorder %v692_v59, 8.507059e+37 }
 0x10b   : > { %v1067_v46 = vpop.eup %1066 }
 0x10c   : > { %v684_v48 = vmul.f32 %v1067_v46, %v682_v43  ;;  %vm689_vm2 = vweird.f32 %v1067_v46 }
 0x10d   : > { %vm690_vm3 = vmor %vm688_vm1, %vm689_vm2 }
 0x10e   : > { %v685_v50 = vsub.f32 1.0, %v684_v48 }
 0x110   : > { %v655_v49 = vpop.f32.mrf.mxu0  ;;  %v686_v53 = vmul.f32 %v1067_v46, %v685_v50 }
 0x111   : > { %v698_v51 = vadd.f32 %v655_v49, %v548_v47 }
 0x112   : > { %v687_v57 = vadd.f32 %v1067_v46, %v686_v53 }
 0x113   : > { %v953_v52 = vmul.f32 -1.442695, %v698_v51  ;;  %v675_v61 = vpop.f32.mrf.mxu1 }
 0x114   : > { %v691_v1 = vsel %vm690_vm3, %v1067_v46, %v687_v57  ;;  %v719_v2 = vadd.f32 %v718_v63, %v675_v61 }
 0x115   : > { %1068 = vpow2.f32 %v953_v52  ;;  %v696_v4 = vsel %vm693_vm4, %v695_v62, %v691_v1 }
 0x116   : > { %v720_v6 = vmul.f32 %v719_v2, %v696_v4 }
 0x118   : > { %v721_v10 = vadd.f32 %v720_v6, %v568_v7 }
 0x11b   : > { %v1069_v60 = vpop.eup %1068 }
 0x11c   : > { %v702_v0 = vadd.f32 1.0, %v1069_v60 }
 0x11e   : > { %1070 = vrcp.f32 %v702_v0  ;;  %v714_v12 = vand.u32 2147483648, %v702_v0  ;;  %v712_v14 = vand.u32 2147483647, %v702_v0  ;;  %vm708_vm6 = vweird.f32 %v702_v0 }
 0x11f   : > { %1072 = vtanh.f32 %v721_v10 }
 0x120   : > { %v715_v16 = vor.u32 1.1754944e-38, %v714_v12  ;;  %vm713_vm8 = vcmp.eq.f32.partialorder %v712_v14, 8.507059e+37 }
 0x124   : > { %v1071_v8 = vpop.eup %1070 }
 0x125   : > { %v704_v9 = vmul.f32 %v1071_v8, %v702_v0  ;;  %vm709_vm5 = vweird.f32 %v1071_v8  ;;  %v1073_v20 = vpop.eup %1072 }
 0x126   : > { %vm710_vm7 = vmor %vm708_vm6, %vm709_vm5 }
 0x127   : > { %v705_v11 = vsub.f32 1.0, %v704_v9 }
 0x129   : > { %v706_v13 = vmul.f32 %v1071_v8, %v705_v11 }
 0x12b   : > { %v707_v15 = vadd.f32 %v1071_v8, %v706_v13 }
 0x12d   : > { %v711_v17 = vsel %vm710_vm7, %v1071_v8, %v707_v15 }
 0x12e   : > { %v716_v18 = vsel %vm713_vm8, %v715_v16, %v711_v17 }
 0x12f   : > { %v723_v19 = vsub.f32 1.0, %v716_v18  ;;  %v725_v22 = vmul.f32 %v716_v18, %v1540_v58 }
 0x131   : > { %v724_v21 = vmul.f32 %v1073_v20, %v723_v19 }
 0x133   : > { %v726_v23 = vadd.f32 %v725_v22, %v724_v21 }
 0x135   : > { %727 = vst [vmem:[%s1622_s10] sm:$0x1] %v726_v23 }
 0x136   : > { %728 = vst [vmem:[#allocation2] sm:$0x1] %v726_v23 }
 0x137 PF: > { %v748_v24 = vld [vmem:[%s1515_s3 + $0x78] sm:$0xff]  ;;  %v747_v25 = vld [vmem:[%s1515_s3 + $0x70] sm:$0xff]  ;;  %v746_v58 = vld [vmem:[%s1515_s3 + $0x68] sm:$0xff]  ;;  %vm772_vm9 = vcmask 1040384   ;;  %v1307_v44 = vmov 0   ;;  %vm795_vm10 = vcmask 0  }
 0x138   : > { %750 = vmatpush.msra.mxu0 %v748_v24  ;;  %v745_v26 = vld [vmem:[%s1515_s3 + $0x60] sm:$0xff]  ;;  %v744_v27 = vld [vmem:[%s1515_s3 + $0x58] sm:$0xff]  ;;  %v743_v28 = vld [vmem:[%s1515_s3 + $0x50] sm:$0xff]  ;;  %1074 = vset.pattern.permute.xlu0 %v1307_v44  ;;  %p954_p5 = scmp.ne.s32.totalorder %s1399_s0, 1 }
 0x139   : > { %v742_v29 = vld [vmem:[%s1515_s3 + $0x48] sm:$0xff]  ;;  %v741_v30 = vld [vmem:[%s1515_s3 + $0x40] sm:$0xff]  ;;  %v740_v31 = vld [vmem:[%s1515_s3 + $0x38] sm:$0xff] }
 0x13a   : > { %751 = vmatpush.msra.mxu0 %v747_v25  ;;  %v739_v32 = vld [vmem:[%s1515_s3 + $0x30] sm:$0xff]  ;;  %v738_v33 = vld [vmem:[%s1515_s3 + $0x28] sm:$0xff]  ;;  %v737_v34 = vld [vmem:[%s1515_s3 + $0x20] sm:$0xff] }
 0x13b   : > { %v736_v35 = vld [vmem:[%s1515_s3 + $0x18] sm:$0xff]  ;;  %v735_v36 = vld [vmem:[%s1515_s3 + $0x10] sm:$0xff]  ;;  %v734_v37 = vld [vmem:[%s1515_s3 + $0x8] sm:$0xff] }
 0x13c   : > { %752 = vmatpush.msra.mxu0 %v746_v58  ;;  %v733_v38 = vld [vmem:[%s1515_s3] sm:$0xff]  ;;  %v749_v40 = vld [vmem:[%s443_s23] sm:$0x1]  ;;  %v771_v45 = vld [vmem:[#allocation3] sm:$0x1] }
 0x13d   : > { %v732_v39 = vld [vmem:[#allocation2] sm:$0x1]  ;;  %v777_v57 = vld [vmem:[#allocation4] sm:$0x1] }
 0x13e   : > { %753 = vmatpush.msra.mxu0 %v745_v26 }
 0x140   : > { %754 = vmatpush.msra.mxu0 %v744_v27 }
 0x142   : > { %755 = vmatpush.msra.mxu0 %v743_v28 }
 0x144   : > { %756 = vmatpush.msra.mxu0 %v742_v29 }
 0x146   : > { %757 = vmatpush.msra.mxu0 %v741_v30 }
 0x148   : > { %758 = vmatpush.msra.mxu0 %v740_v31 }
 0x14a   : > { %759 = vmatpush.msra.mxu0 %v739_v32 }
 0x14c   : > { %760 = vmatpush.msra.mxu0 %v738_v33 }
 0x14e   : > { %761 = vmatpush.msra.mxu0 %v737_v34 }
 0x150   : > { %762 = vmatpush.msra.mxu0 %v736_v35 }
 0x152   : > { %763 = vmatpush.msra.mxu0 %v735_v36 }
 0x154   : > { %764 = vmatpush.msra.mxu0 %v734_v37 }
 0x156   : > { %765 = vmatpush.msra.mxu0 %v733_v38 }
 0x157   : > { %766 = vmatmul.f32.vlgmr.msra.gmra.mxu0 %v732_v39 }
 0x1d4   : > { %v767_v41 = vpop.f32.mrf.mxu0 }
 0x1d5   : > { %v768_v42 = vadd.f32 %v767_v41, %v749_v40 }
 0x1d7   : > { %770 = vst [vmem:[%s446_s16] sm:$0x1] %v768_v42  ;;  %v773_v43 = vsel %vm772_vm9, %v768_v42, -inf }
 0x1d8   : > { %774 = vmax.xlane.f32.xlu0 %v773_v43 }
 0x24b   : > { %v775_v46 = vpop.xlane.xlu0 %774 }
 0x24c   : > { %v776_v47 = vmax.f32 %v771_v45, %v775_v46 }
 0x24e   : > { %v778_v48 = vsub.f32 %v771_v45, %v776_v47  ;;  %797 = vst.msk [vmem:[#allocation3] sm:$0x1] %vm795_vm10, %v776_v47  ;;  %784 = vperm.xlu0 %1074, %v776_v47  }
 0x250   : > { %v779_v55 = vmul.f32 1.442695, %v778_v48 }
 0x2c0   : > { %v785_v49 = vpop.permute.xlu0 %784 }
 0x2c1   : > { %v787_v50 = vperm.slane %v785_v49, 0 }
 0x2c3   : > { %v788_v51 = vsub.f32 %v768_v42, %v787_v50 }
 0x2c5   : > { %v789_v52 = vmul.f32 1.442695, %v788_v51 }
 0x2c7   : > { %1075 = vpow2.f32 %v789_v52 }
 0x2c8   : > { %1077 = vpow2.f32 %v779_v55 }
 0x2cd   : > { %v1076_v53 = vpop.eup %1075 }
 0x2ce   : > { %v791_v54 = vsel %vm772_vm9, %v1076_v53, 0.0  ;;  %v1078_v56 = vpop.eup %1077 }
 0x2cf   : > { %792 = vadd.xlane.f32.xlu1 %v791_v54  ;;  %v781_v59 = vmul.f32 %v1078_v56, %v777_v57 }
 0x341   : > { %801 = sbr.rel (%p954_p5) target bundleno = 857 (0x359), region = 76 }
 0x342   : > { %v793_v60 = vpop.xlane.xlu1 %792 }
 0x343   : > { %v794_v61 = vadd.f32 %v793_v60, %v781_v59 }
 0x345   : > { %796 = vst.msk [vmem:[#allocation4] sm:$0x1] %vm795_vm10, %v794_v61 }
 0x346   : > { %v802_v0 = vld [vmem:[#allocation3] sm:$0x1] }
 0x34c   : > { %v803_v62 = vld [vmem:[#allocation4] sm:$0x1] }
 0x34d   : > { %1079 = vlog2.f32 %v803_v62 }
 0x353   : > { %v1080_v63 = vpop.eup %1079 }
 0x354   : > { %v805_v1 = vmul.f32 0.6931472, %v1080_v63 }
 0x356   : > { %v806_v2 = vadd.f32 %v805_v1, %v802_v0 }
 0x358   : > { %807 = vst.msk [vmem:[#allocation15] sm:$0x1] %vm795_vm10, %v806_v2 }
 0x359 PF: > { %p994_p10 = scmp.eq.s32.totalorder %s1399_s0, 1  ;;  %s1308_s3 = smov [#allocation15]  }
 0x35a   : > { %s823_s29 = sshll.u32 %s1308_s3, 4  ;;  %s1642_s24 = sld [smem:[#allocation23_spill]]  ;;  %s824_s29 = int_to_ptr.vmem [resolvable:$true] %s823_s29 }
 0x360   : > { %s825_s16 = sshll.u32 %s1642_s24, 4  ;;  %s826_s16 = int_to_ptr.hbm [resolvable:$true] %s825_s16 }
 0x361   : > { %972 = dma.vmem_to_hbm [thread:$0]  (%p994_p10), %s824_s29, 16, %s826_s16, [#allocation9]  }
 0x362   : > { %1270 = dma.done.wait (%p994_p10), [#allocation9], 16  }
 0x363   : > { %1272 = vsyncadd (%p994_p10), [#allocation9], 4294967280 }
 0x364 PF: > { %s1643_s22 = sld [smem:[#allocation20_spill]]  ;;  %p26_p11 = scmp.ge.s32.totalorder %s1473_s14, 4  }
 0x365   : > { %s1644_s19 = smov %s1279_s20  ;;  %s1645_s20 = smov %s1283_s21 }
 0x366   : > { %s1646_s21 = smov %s1484_s30  ;;  %s1607_s23 = smov 0  }
 0x367   : > { %s1647_s24 = smov %s1473_s14  ;;  %28 = sbr.rel (!%p26_p11) target bundleno = 12 (0xc), region = 134 }
 0x36c   :  { %848 = vsyncpa [#allocation8], 1 }
 0x36d   :  { %850 = vsyncpa [#allocation8 + $0x1], 1 }
 0x36e   :  { %851 = vsyncpa [#allocation11], 1 }
 0x36f   :  { %852 = vsyncpa [#allocation14], 1 }
 0x370   :  { %854 = vsyncpa [#allocation14 + $0x1], 1 }
 0x371   :  { %855 = vsyncpa [#allocation9], 1 }
 0x372   :  { %857 = vsyncpa [#allocation9 + $0x1], 1 }

</bundles_post_ra>
